<compile_context>
chip_gen: v6e
topology: v6e:2x2x1
jax: 0.10.0
libtpu: 0.0.40
codegen_flags: <defaults>
</compile_context>

<pallas_src>
import math

import jax
import jax.numpy as jnp
from jax.experimental import pallas as pl
from jax.experimental.pallas import tpu as pltpu


# ---------------------------------------------------------------------------
# Kernels
# ---------------------------------------------------------------------------
def _make_fused_kernel(hw_total):
    """Single-invocation kernel: pool + MLP + Gaussian projection + apply."""
    inv_hw = 1.0 / float(hw_total)
    sqrt_2pi = math.sqrt(2.0 * math.pi)

    def kernel(x_ref, w1_ref, b1_ref, w2_ref, b2_ref, o_ref):
        x = x_ref[...]                                          # (N, C, HW)
        xf = x.astype(jnp.float32)
        pooled = jnp.sum(xf, axis=-1) * inv_hw                  # (N, C) f32

        # Tiny 2-layer MLP as broadcast-multiply + sublane reduces (VPU/XLU),
        # avoiding MXU lowering of tiny, unaligned matrices.
        w1 = w1_ref[...]                                        # (C, Cr)
        w2 = w2_ref[...]                                        # (Cr, C)
        h = jnp.sum(pooled[:, :, None] * w1[None, :, :], axis=1) + b1_ref[...]
        h = jnp.maximum(h, 0.0)                                 # (N, Cr)
        att = jnp.sum(h[:, :, None] * w2[None, :, :], axis=1) + b2_ref[...]

        n_el = att.shape[0] * att.shape[1]
        mean = jnp.sum(att, keepdims=True) * (1.0 / n_el)       # (1, 1)
        diff = att - mean
        var = jnp.sum(diff * diff, keepdims=True) * (1.0 / max(n_el - 1, 1))
        var = jnp.maximum(var, 1e-30)                           # guard /0
        std = jnp.sqrt(var)
        scale = jnp.exp(-(diff * diff) / (2.0 * var)) / (sqrt_2pi * std)
        o_ref[...] = x * scale[:, :, None].astype(x.dtype)

    return kernel


def _make_pool_sum_kernel(hw_total, hw_tile, tiles_per_split, has_remainder):
    """Pooled-sum over the spatial lanes, accumulated across the HW grid axis."""
    num_tiles = (hw_total + hw_tile - 1) // hw_tile
    last_tile = num_tiles - 1
    rem = hw_total - last_tile * hw_tile                        # valid lanes in last tile

    def kernel(x_ref, sum_ref):
        # x_ref:   (Nb, C, hw_tile)   input dtype
        # sum_ref: (1, 1, Nb, C)      f32, resident across the k axis
        s = pl.program_id(0)
        k = pl.program_id(2)

        @pl.when(k == 0)
        def _():
            sum_ref[...] = jnp.zeros_like(sum_ref)

        x = x_ref[...].astype(jnp.float32)

        if has_remainder:
            t = s * tiles_per_split + k                         # logical HW tile

            @pl.when(t != last_tile)
            def _full():
                sum_ref[...] += jnp.sum(x, axis=-1)[None, None]

            @pl.when(t == last_tile)
            def _partial():
                lane = jax.lax.broadcasted_iota(jnp.int32, x.shape, 2)
                xm = jnp.where(lane < rem, x, 0.0)
                sum_ref[...] += jnp.sum(xm, axis=-1)[None, None]
        else:
            sum_ref[...] += jnp.sum(x, axis=-1)[None, None]

    return kernel


def _apply_scale_kernel(x_ref, scale_ref, o_ref):
    """o = x * scale, broadcast over the spatial lanes, in the input dtype."""
    # x_ref:     (Nb, C, hw_tile)
    # scale_ref: (Nb, C, 1)   (pre-cast to x dtype in the wrapper)
    o_ref[...] = x_ref[...] * scale_ref[...]


# ---------------------------------------------------------------------------
# Sizing helpers
# ---------------------------------------------------------------------------
def _default_vmem_limit():
    """Generation-aware scoped-VMEM limit (64 MiB on 128 MiB chips, 32 MiB on v7x)."""
    try:
        cap = int(pltpu.get_tpu_info().vmem_capacity_bytes)
    except Exception:
        cap = 64 * 1024 * 1024                      # conservative fallback
    return max(16 * 1024 * 1024, min(cap // 2, 64 * 1024 * 1024))


def _choose_blocks(N, C, HW, itemsize, vmem_limit):
    """Pick (batch_block, hw_tile) so each grid step moves a few MiB."""
    # The apply pass keeps ~4 blocks in flight (input + output, double-buffered).
    per_block = min(8 * 1024 * 1024, (vmem_limit * 3 // 4) // 4)
    row_bytes = C * itemsize
    max_lanes = max(128, (per_block // max(1, row_bytes)) // 128 * 128)
    if HW <= max_lanes:
        hw_tile = HW                                 # full spatial extent
        nb = max(1, min(N, per_block // max(1, row_bytes * HW)))
    else:
        hw_tile = max_lanes                          # multiple of 128
        nb = 1
    return nb, hw_tile


# ---------------------------------------------------------------------------
# Wrapper
# ---------------------------------------------------------------------------
def channel_gate(x_nchw, w1, b1, w2, b2, *, hw_tile=None, batch_block=None, fuse=None):
    """ChannelGate forward.

    x_nchw: (N, C, H, W), any float dtype (kept for HBM I/O).
    w1: (C, C//r), b1: (C//r,), w2: (C//r, C), b2: (C,)  -- transpose of
    PyTorch nn.Linear.weight.
    """
    N, C, H, W = x_nchw.shape
    HW = H * W
    x3 = x_nchw.reshape(N, C, HW)
    in_dtype = x3.dtype
    itemsize = jnp.dtype(in_dtype).itemsize
    Cr = w1.shape[1]

    w1f = w1.astype(jnp.float32)
    b1f = b1.reshape(1, -1).astype(jnp.float32)
    w2f = w2.astype(jnp.float32)
    b2f = b2.reshape(1, -1).astype(jnp.float32)

    vmem_limit = _default_vmem_limit()

    if fuse is None:
        # x (in) + out + f32 working copy + broadcast temp + MLP intermediates.
        fused_bytes = (N * C * HW) * (3 * itemsize + 4) \
            + 8 * N * C * max(Cr, 1) + (1 << 20)
        fuse = fused_bytes <= (vmem_limit * 3) // 4

    # ---- fused single-block path (x resident in VMEM, one HBM read + write) ----
    if fuse:
        out = pl.pallas_call(
            _make_fused_kernel(HW),
            out_shape=jax.ShapeDtypeStruct((N, C, HW), in_dtype),
            in_specs=[pl.BlockSpec(memory_space=pltpu.MemorySpace.VMEM)] * 5,
            out_specs=pl.BlockSpec(memory_space=pltpu.MemorySpace.VMEM),
            compiler_params=pltpu.CompilerParams(vmem_limit_bytes=vmem_limit),
        )(x3, w1f, b1f, w2f, b2f)
        return out.reshape(N, C, H, W)

    # ---- two-pass streaming path ------------------------------------------
    nb_d, hw_d = _choose_blocks(N, C, HW, itemsize, vmem_limit)
    nb = max(1, min(N, batch_block if batch_block is not None else nb_d))
    hw_tile = min(HW, hw_tile if hw_tile is not None else hw_d)

    num_hw_tiles = pl.cdiv(HW, hw_tile)
    n_nblocks = pl.cdiv(N, nb)
    has_remainder = (HW % hw_tile) != 0

    # Megacore: when the batch axis alone can't feed both cores, split the HW
    # tiles across a leading parallel axis (even split only; combined below).
    n_split = 2 if (n_nblocks == 1 and num_hw_tiles >= 8
                    and num_hw_tiles % 2 == 0) else 1
    tps = num_hw_tiles // n_split

    block_bytes = nb * C * hw_tile * itemsize
    vmem_limit_run = max(vmem_limit, 4 * block_bytes + (2 << 20))

    # ---- pass 1: pooled sum over the spatial axis (f32 accumulation) -------
    pooled_sum = pl.pallas_call(
        _make_pool_sum_kernel(HW, hw_tile, tps, has_remainder),
        out_shape=jax.ShapeDtypeStruct((n_split, n_nblocks, nb, C), jnp.float32),
        grid=(n_split, n_nblocks, tps),
        in_specs=[pl.BlockSpec((nb, C, hw_tile),
                               lambda s, b, k: (b, 0, s * tps + k))],
        out_specs=pl.BlockSpec((1, 1, nb, C), lambda s, b, k: (s, b, 0, 0)),
        compiler_params=pltpu.CompilerParams(
            dimension_semantics=("parallel", "parallel", "arbitrary"),
            vmem_limit_bytes=vmem_limit_run),
    )(x3)
    pooled = pooled_sum.sum(axis=0).reshape(n_nblocks * nb, C)[:N]
    pooled = pooled * jnp.float32(1.0 / HW)                      # exact avg pool

    # ---- tiny MLP + global mean/std + Gaussian projection (plain JAX) ------
    P = jax.lax.Precision.HIGHEST
    h = jnp.maximum(jnp.dot(pooled, w1f, precision=P) + b1f, 0.0)
    att = jnp.dot(h, w2f, precision=P) + b2f                     # (N, C)

    n_el = att.size
    mean = jnp.mean(att)
    var = jnp.sum((att - mean) ** 2) / max(n_el - 1, 1)          # ddof=1 (torch.std)
    var = jnp.maximum(var, jnp.finfo(jnp.float32).tiny)
    std = jnp.sqrt(var)
    sigma = math.sqrt(2.0 * math.pi) * std
    scale = jnp.exp(-((att - mean) ** 2) / (2.0 * var)) / sigma  # (N, C)
    scale3 = scale.reshape(N, C, 1).astype(in_dtype)             # cast once

    # ---- pass 2: broadcast-apply over x (native dtype, pure streaming) -----
    out = pl.pallas_call(
        _apply_scale_kernel,
        out_shape=jax.ShapeDtypeStruct((N, C, HW), in_dtype),
        grid=(n_nblocks, num_hw_tiles),
        in_specs=[
            pl.BlockSpec((nb, C, hw_tile), lambda b, k: (b, 0, k)),
            pl.BlockSpec((nb, C, 1), lambda b, k: (b, 0, 0)),
        ],
        out_specs=pl.BlockSpec((nb, C, hw_tile), lambda b, k: (b, 0, k)),
        compiler_params=pltpu.CompilerParams(
            dimension_semantics=("parallel", "parallel"),
            vmem_limit_bytes=vmem_limit_run),
    )(x3, scale3)
    return out.reshape(N, C, H, W)


# ---------------------------------------------------------------------------
# Pure-JAX reference (mirrors the PyTorch forward)
# ---------------------------------------------------------------------------
def channel_gate_ref(x_nchw, w1, b1, w2, b2):
    xf = x_nchw.astype(jnp.float32)
    pooled = jnp.mean(xf, axis=(2, 3))                           # (N, C)
    P = jax.lax.Precision.HIGHEST
    h = jnp.maximum(jnp.dot(pooled, w1, precision=P) + b1, 0.0)
    att = jnp.dot(h, w2, precision=P) + b2
    mean = jnp.mean(att)
    std = jnp.std(att, ddof=1)
    sigma = math.sqrt(2.0 * math.pi) * std
    scale = jnp.exp(-((att - mean) ** 2) / (2.0 * std ** 2)) / sigma
    return xf * scale[:, :, None, None]


# ---------------------------------------------------------------------------
# Self-test
# ---------------------------------------------------------------------------
if __name__ == "__main__":
    C = 32
    reduction_ratio = 16
    Cr = C // reduction_ratio

    key = jax.random.PRNGKey(0)
    kx, kw1, kb1, kw2, kb2, kx2, kx3 = jax.random.split(key, 7)

    # PyTorch-Linear-style init U(-1/sqrt(fan_in), 1/sqrt(fan_in)), stored (in, out).
    lim1 = 1.0 / math.sqrt(C)
    w1 = jax.random.uniform(kw1, (C, Cr), jnp.float32, -lim1, lim1)
    b1 = jax.random.uniform(kb1, (Cr,), jnp.float32, -lim1, lim1)
    lim2 = 1.0 / math.sqrt(Cr)
    w2 = jax.random.uniform(kw2, (Cr, C), jnp.float32, -lim2, lim2)
    b2 = jax.random.uniform(kb2, (C,), jnp.float32, -lim2, lim2)

    # --- check 1: small f32 input -> fused single-VMEM-block path -----------
    x = jax.random.normal(kx, (2, C, 16, 16), dtype=jnp.float32)
    out = jax.block_until_ready(channel_gate(x, w1, b1, w2, b2))
    ref = channel_gate_ref(x, w1, b1, w2, b2)
    assert out.shape == x.shape
    assert jnp.allclose(out, ref, atol=1e-4, rtol=1e-4), "fused f32 mismatch"

    # --- check 2: two-pass path with HW split, batch block and remainder mask
    x2 = jax.random.normal(kx2, (2, C, 46, 50), dtype=jnp.float32)   # HW=2300
    out2 = jax.block_until_ready(
        channel_gate(x2, w1, b1, w2, b2, fuse=False, hw_tile=128, batch_block=2))
    ref2 = channel_gate_ref(x2, w1, b1, w2, b2)
    assert jnp.allclose(out2, ref2, atol=1e-4, rtol=1e-4), "two-pass f32 mismatch"

    # --- check 3: two-pass bf16 path with a partial batch block -------------
    x3 = jax.random.normal(kx3, (3, C, 16, 16), dtype=jnp.float32).astype(jnp.bfloat16)
    out3 = jax.block_until_ready(
        channel_gate(x3, w1, b1, w2, b2, fuse=False, batch_block=2))
    ref3 = channel_gate_ref(x3, w1, b1, w2, b2)
    assert out3.dtype == jnp.bfloat16
    assert jnp.allclose(out3.astype(jnp.float32), ref3, atol=5e-2, rtol=5e-2), \
        "two-pass bf16 mismatch"

    # --- check 4: fused bf16 path --------------------------------------------
    xb = x.astype(jnp.bfloat16)
    outb = jax.block_until_ready(channel_gate(xb, w1, b1, w2, b2))
    refb = channel_gate_ref(xb, w1, b1, w2, b2)
    assert outb.dtype == jnp.bfloat16
    assert jnp.allclose(outb.astype(jnp.float32), refb, atol=5e-2, rtol=5e-2), \
        "fused bf16 mismatch"

    print("KERNEL_OK")
</pallas_src>

<mosaic_0001>
module attributes {stable_mosaic.version = 11 : i64} {
  func.func @kernel(%arg0: memref<2x32x256xf32, #tpu.memory_space<vmem>>, %arg1: memref<32x2xf32, #tpu.memory_space<vmem>>, %arg2: memref<1x2xf32, #tpu.memory_space<vmem>>, %arg3: memref<2x32xf32, #tpu.memory_space<vmem>>, %arg4: memref<1x32xf32, #tpu.memory_space<vmem>>, %arg5: memref<2x32x256xf32, #tpu.memory_space<vmem>>) attributes {dimension_semantics = [], scalar_prefetch = 0 : i64, scratch_operands = 0 : i64, tpu.core_type = #tpu.core_type<tc>} {
    %c0 = arith.constant 0 : index
    %c0_0 = arith.constant 0 : index
    %c0_1 = arith.constant 0 : index
    %0 = vector.load %arg0[%c0, %c0_0, %c0_1] : memref<2x32x256xf32, #tpu.memory_space<vmem>>, vector<2x32x256xf32>
    %cst = arith.constant dense<0.000000e+00> : vector<2x32xf32>
    %1 = vector.multi_reduction <add>, %0, %cst [2] : vector<2x32x256xf32> to vector<2x32xf32>
    %cst_2 = arith.constant 3.906250e-03 : f32
    %2 = vector.broadcast %cst_2 : f32 to vector<2x32xf32>
    %3 = arith.mulf %1, %2 : vector<2x32xf32>
    %c0_3 = arith.constant 0 : index
    %c0_4 = arith.constant 0 : index
    %4 = vector.load %arg1[%c0_3, %c0_4] : memref<32x2xf32, #tpu.memory_space<vmem>>, vector<32x2xf32>
    %c0_5 = arith.constant 0 : index
    %c0_6 = arith.constant 0 : index
    %5 = vector.load %arg3[%c0_5, %c0_6] : memref<2x32xf32, #tpu.memory_space<vmem>>, vector<2x32xf32>
    %6 = vector.shape_cast %3 : vector<2x32xf32> to vector<2x32x1xf32>
    %7 = vector.shape_cast %4 : vector<32x2xf32> to vector<1x32x2xf32>
    %8 = vector.broadcast %6 : vector<2x32x1xf32> to vector<2x32x2xf32>
    %9 = vector.broadcast %7 : vector<1x32x2xf32> to vector<2x32x2xf32>
    %10 = arith.mulf %8, %9 : vector<2x32x2xf32>
    %cst_7 = arith.constant dense<0.000000e+00> : vector<2x2xf32>
    %11 = vector.multi_reduction <add>, %10, %cst_7 [1] : vector<2x32x2xf32> to vector<2x2xf32>
    %c0_8 = arith.constant 0 : index
    %c0_9 = arith.constant 0 : index
    %12 = vector.load %arg2[%c0_8, %c0_9] : memref<1x2xf32, #tpu.memory_space<vmem>>, vector<1x2xf32>
    %13 = vector.broadcast %12 : vector<1x2xf32> to vector<2x2xf32>
    %14 = arith.addf %11, %13 : vector<2x2xf32>
    %cst_10 = arith.constant 0.000000e+00 : f32
    %15 = vector.broadcast %cst_10 : f32 to vector<2x2xf32>
    %16 = arith.maximumf %14, %15 : vector<2x2xf32>
    %17 = vector.shape_cast %16 : vector<2x2xf32> to vector<2x2x1xf32>
    %18 = vector.shape_cast %5 : vector<2x32xf32> to vector<1x2x32xf32>
    %19 = vector.broadcast %17 : vector<2x2x1xf32> to vector<2x2x32xf32>
    %20 = vector.broadcast %18 : vector<1x2x32xf32> to vector<2x2x32xf32>
    %21 = arith.mulf %19, %20 : vector<2x2x32xf32>
    %cst_11 = arith.constant dense<0.000000e+00> : vector<2x32xf32>
    %22 = vector.multi_reduction <add>, %21, %cst_11 [1] : vector<2x2x32xf32> to vector<2x32xf32>
    %c0_12 = arith.constant 0 : index
    %c0_13 = arith.constant 0 : index
    %23 = vector.load %arg4[%c0_12, %c0_13] : memref<1x32xf32, #tpu.memory_space<vmem>>, vector<1x32xf32>
    %24 = vector.broadcast %23 : vector<1x32xf32> to vector<2x32xf32>
    %25 = arith.addf %22, %24 : vector<2x32xf32>
    %26 = vector.shape_cast %25 : vector<2x32xf32> to vector<1x2x32xf32>
    %cst_14 = arith.constant dense<0.000000e+00> : vector<1xf32>
    %27 = vector.multi_reduction <add>, %26, %cst_14 [1, 2] : vector<1x2x32xf32> to vector<1xf32>
    %28 = vector.shape_cast %27 : vector<1xf32> to vector<1x1x1xf32>
    %29 = vector.extract %28[0, 0, 0] : f32 from vector<1x1x1xf32>
    %30 = vector.broadcast %29 : f32 to vector<1x1xf32>
    %cst_15 = arith.constant 1.562500e-02 : f32
    %31 = vector.broadcast %cst_15 : f32 to vector<1x1xf32>
    %32 = arith.mulf %30, %31 : vector<1x1xf32>
    %33 = vector.broadcast %32 : vector<1x1xf32> to vector<2x32xf32>
    %34 = arith.subf %25, %33 : vector<2x32xf32>
    %35 = arith.mulf %34, %34 : vector<2x32xf32>
    %36 = vector.shape_cast %35 : vector<2x32xf32> to vector<1x2x32xf32>
    %cst_16 = arith.constant dense<0.000000e+00> : vector<1xf32>
    %37 = vector.multi_reduction <add>, %36, %cst_16 [1, 2] : vector<1x2x32xf32> to vector<1xf32>
    %38 = vector.shape_cast %37 : vector<1xf32> to vector<1x1x1xf32>
    %39 = vector.extract %38[0, 0, 0] : f32 from vector<1x1x1xf32>
    %40 = vector.broadcast %39 : f32 to vector<1x1xf32>
    %cst_17 = arith.constant 0.0158730168 : f32
    %41 = vector.broadcast %cst_17 : f32 to vector<1x1xf32>
    %42 = arith.mulf %40, %41 : vector<1x1xf32>
    %cst_18 = arith.constant 1.000000e-30 : f32
    %43 = vector.broadcast %cst_18 : f32 to vector<1x1xf32>
    %44 = arith.maximumf %42, %43 : vector<1x1xf32>
    %45 = math.sqrt %44 : vector<1x1xf32>
    %46 = arith.mulf %34, %34 : vector<2x32xf32>
    %cst_19 = arith.constant 0.000000e+00 : f32
    %47 = vector.broadcast %cst_19 : f32 to vector<2x32xf32>
    %48 = arith.subf %47, %46 : vector<2x32xf32>
    %cst_20 = arith.constant 2.000000e+00 : f32
    %49 = vector.broadcast %cst_20 : f32 to vector<1x1xf32>
    %50 = arith.mulf %49, %44 : vector<1x1xf32>
    %51 = vector.broadcast %50 : vector<1x1xf32> to vector<2x32xf32>
    %52 = arith.divf %48, %51 : vector<2x32xf32>
    %53 = math.exp %52 : vector<2x32xf32>
    %cst_21 = arith.constant 2.50662827 : f32
    %54 = vector.broadcast %cst_21 : f32 to vector<1x1xf32>
    %55 = arith.mulf %54, %45 : vector<1x1xf32>
    %56 = vector.broadcast %55 : vector<1x1xf32> to vector<2x32xf32>
    %57 = arith.divf %53, %56 : vector<2x32xf32>
    %58 = vector.shape_cast %57 : vector<2x32xf32> to vector<2x32x1xf32>
    %59 = vector.broadcast %58 : vector<2x32x1xf32> to vector<2x32x256xf32>
    %60 = arith.mulf %0, %59 : vector<2x32x256xf32>
    %c0_22 = arith.constant 0 : index
    %c0_23 = arith.constant 0 : index
    %c0_24 = arith.constant 0 : index
    %61 = vector.load %arg5[%c0_22, %c0_23, %c0_24] : memref<2x32x256xf32, #tpu.memory_space<vmem>>, vector<2x32x256xf32>
    tpu.vector_store %arg5[%c0_22, %c0_23, %c0_24], %60 {strides = array<i32>} : memref<2x32x256xf32, #tpu.memory_space<vmem>>, vector<2x32x256xf32>,
    return
  }
}

</mosaic_0001>

<bundles_post_ra>
// kernel: tpu_custom_call.1
= control target key start
LH: loop header
LB: loop body
LE: loop exit
PB: predicated region body
PF: predicated region fallthrough
CT: control target
= control target key end

     0   :  { %10 = vsyncpa [#allocation3], 0  ;;  %s537_s0 = inlined_call_operand.hbm [shape: f32[2,32,256], index: 0, kind: input, shape index: {}]   ;;  %s538_s1 = inlined_call_operand.vmem [shape: f32[32,2], index: 1, kind: input, shape index: {}]   ;;  %s539_s2 = inlined_call_operand.vmem [shape: f32[1,2], index: 2, kind: input, shape index: {}]   ;;  %s540_s3 = inlined_call_operand.vmem [shape: f32[2,32], index: 3, kind: input, shape index: {}]   ;;  %s541_s4 = inlined_call_operand.vmem [shape: f32[1,32], index: 4, kind: input, shape index: {}]   ;;  %s542_s5 = inlined_call_operand.hbm [shape: f32[2,32,256], index: 5, kind: output, shape index: {}]  }
   0x1   :  { %11 = vsyncpa [#allocation4], 0  ;;  %s386_s18 = smov [#allocation2]  }
   0x2   :  { %s17_s19 = sshll.u32 %s386_s18, 4  ;;  %s18_s19 = int_to_ptr.vmem [resolvable:$true] %s17_s19 }
   0x3   :  { %s350_s20 = scalar_lea.vmem %s18_s19, 2048  ;;  %p355_p1 = scmp.lt.s32.totalorder %s18_s19, %s18_s19 }
   0x4   :  { %p351_p0 = scmp.ne.s32.totalorder %s18_s19, %s350_s20  ;;  %p356_p2 = scmp.lt.s32.totalorder %s350_s20, %s350_s20 }
   0x6   :  { %p357_p3 = por %p356_p2, %p355_p1 }
   0x8   :  { %p358_p4 = pnand %p357_p3, %p351_p0 }
   0xa   :  { %361 = shalt.err (!%p358_p4)
}
   0xb   :  { %s387_s21 = smov 256   ;;  %s388_s22 = smov 16  }
   0xc   :  { %23 = dma.hbm_to_vmem [thread:$0]  %s537_s0, 2048, %s18_s19, [#allocation3], %s387_s21, %s387_s21, %s388_s22  }
   0xd   :  { %382 = dma.done.wait [#allocation3], 2048  }
   0xe   :  { %383 = vsyncadd [#allocation3], 4294965248  ;;  %v426_v0 = vld [vmem:[#allocation2 + $0x40] sm:$0xff]  ;;  %v428_v1 = vld [vmem:[#allocation2 + $0x48] sm:$0xff]  ;;  %vm96_vm0 = vcmask 15360   ;;  %vm150_vm1 = vcmask 254976  }
   0xf   :  { %v430_v2 = vld [vmem:[#allocation2] sm:$0xff]  ;;  %v63_v3 = vadd.f32 %v428_v1, %v426_v0  ;;  %v434_v4 = vld [vmem:[#allocation2 + $0x8] sm:$0xff]  ;;  %v436_v5 = vld [vmem:[#allocation2 + $0x50] sm:$0xff]  ;;  %vm177_vm2 = vcmask 1041409   ;;  %s389_s11 = smov [#allocation5]  }
  0x10   :  { %v438_v6 = vld [vmem:[#allocation2 + $0x58] sm:$0xff]  ;;  %v51_v7 = vadd.f32 %v434_v4, %v430_v2  ;;  %v442_v8 = vld [vmem:[#allocation2 + $0x10] sm:$0xff]  ;;  %v450_v12 = vld [vmem:[#allocation2 + $0x60] sm:$0xff]  ;;  %s310_s12 = sshll.u32 %s389_s11, 4  ;;  %s311_s12 = int_to_ptr.vmem [resolvable:$true] %s310_s12 }
  0x11   :  { %v444_v9 = vld [vmem:[#allocation2 + $0x18] sm:$0xff]  ;;  %64 = vadd.xlane.f32.xlu0 %v63_v3  ;;  %v66_v10 = vadd.f32 %v438_v6, %v436_v5  ;;  %v452_v13 = vld [vmem:[#allocation2 + $0x68] sm:$0xff]  ;;  %v454_v14 = vld [vmem:[#allocation2 + $0x20] sm:$0xff]  ;;  %s362_s13 = scalar_lea.vmem %s311_s12, 2048  ;;  %p367_p6 = scmp.lt.s32.totalorder %s311_s12, %s311_s12 }
  0x12   :  { %52 = vadd.xlane.f32.xlu1 %v51_v7  ;;  %v54_v11 = vadd.f32 %v444_v9, %v442_v8  ;;  %v456_v15 = vld [vmem:[#allocation2 + $0x28] sm:$0xff]  ;;  %v69_v16 = vadd.f32 %v452_v13, %v450_v12  ;;  %v462_v18 = vld [vmem:[#allocation2 + $0x70] sm:$0xff]  ;;  %v464_v19 = vld [vmem:[#allocation2 + $0x78] sm:$0xff]  ;;  %p363_p5 = scmp.ne.s32.totalorder %s311_s12, %s362_s13  ;;  %p368_p7 = scmp.lt.s32.totalorder %s362_s13, %s362_s13 }
  0x13   :  { %v57_v17 = vadd.f32 %v456_v15, %v454_v14  ;;  %v466_v20 = vld [vmem:[#allocation2 + $0x30] sm:$0xff]  ;;  %v468_v21 = vld [vmem:[#allocation2 + $0x38] sm:$0xff]  ;;  %v72_v22 = vadd.f32 %v464_v19, %v462_v18  ;;  %v84_v26 = vld [vmem:[%s538_s1 + $0x8] sm:$0xff] }
  0x14   :  { %v60_v23 = vadd.f32 %v468_v21, %v466_v20  ;;  %v83_v31 = vld [vmem:[%s538_s1] sm:$0xff]  ;;  %v85_v36 = vld [vmem:[%s538_s1 + $0x10] sm:$0xff]  ;;  %v86_v47 = vld [vmem:[%s538_s1 + $0x18] sm:$0xff]  ;;  %p369_p8 = por %p368_p7, %p367_p6 }
  0x15   :  { %67 = vadd.xlane.f32.xlu0 %v66_v10 }
  0x16   :  { %55 = vadd.xlane.f32.xlu1 %v54_v11  ;;  %p370_p9 = pnand %p369_p8, %p363_p5 }
  0x19   :  { %70 = vadd.xlane.f32.xlu0 %v69_v16 }
  0x1a   :  { %58 = vadd.xlane.f32.xlu1 %v57_v17 }
  0x1d   :  { %73 = vadd.xlane.f32.xlu0 %v72_v22 }
  0x1e   :  { %61 = vadd.xlane.f32.xlu1 %v60_v23  ;;  %v134_v23 = vlaneseq }
  0x9a   :  { %v65_v24 = vpop.xlane.xlu0 %64 }
  0x9b   :  { %v53_v25 = vpop.xlane.xlu1 %52  ;;  %v79_v28 = vmul.f32 0.00390625, %v65_v24 }
  0x9c   :  { %v75_v32 = vmul.f32 0.00390625, %v53_v25 }
  0x9d   :  { %v92_v38 = vmul.f32 %v83_v31, %v79_v28  ;;  %v135_v28 = vshrl.u32 %v134_v23, 7 }
  0x9e   :  { %v68_v27 = vpop.xlane.xlu0 %67  ;;  %v88_v41 = vmul.f32 %v83_v31, %v75_v32 }
  0x9f   :  { %v80_v29 = vmul.f32 0.00390625, %v68_v27  ;;  %v56_v30 = vpop.xlane.xlu1 %55  ;;  %v110_v49 = vsel %vm96_vm0, %v92_v38, 0.0 }
  0xa0   :  { %v76_v33 = vmul.f32 0.00390625, %v56_v30  ;;  %v97_v53 = vsel %vm96_vm0, %v88_v41, 0.0 }
  0xa1   :  { %v93_v34 = vmul.f32 %v84_v26, %v80_v29  ;;  %v322_v29 = vld [vmem:[%s539_s2] ss:$0 sm:$0xff] }
  0xa2   :  { %v89_v35 = vmul.f32 %v84_v26, %v76_v33  ;;  %v71_v37 = vpop.xlane.xlu0 %70 }
  0xa3   :  { %v81_v39 = vmul.f32 0.00390625, %v71_v37  ;;  %v59_v40 = vpop.xlane.xlu1 %58  ;;  %v111_v43 = vsel %vm96_vm0, %v93_v34, 0.0  ;;  %v497_v34 = vsub.s32 0, %v135_v28 }
  0xa4   :  { %v77_v42 = vmul.f32 0.00390625, %v59_v40  ;;  %v98_v45 = vsel %vm96_vm0, %v89_v35, 0.0  ;;  %v112_v54 = vadd.f32 %v111_v43, %v110_v49  ;;  %v87_v40 = vld [vmem:[%s540_s3] sm:$0x3] }
  0xa5   :  { %v94_v44 = vmul.f32 %v85_v36, %v81_v39  ;;  %v99_v57 = vadd.f32 %v98_v45, %v97_v53 }
  0xa6   :  { %v90_v46 = vmul.f32 %v85_v36, %v77_v42  ;;  %v74_v48 = vpop.xlane.xlu0 %73 }
  0xa7   :  { %v113_v50 = vsel %vm96_vm0, %v94_v44, 0.0  ;;  %v82_v51 = vmul.f32 0.00390625, %v74_v48  ;;  %v62_v52 = vpop.xlane.xlu1 %61 }
  0xa8   :  { %v100_v55 = vsel %vm96_vm0, %v90_v46, 0.0  ;;  %v78_v56 = vmul.f32 0.00390625, %v62_v52  ;;  %v114_v59 = vadd.f32 %v113_v50, %v112_v54 }
  0xa9   :  { %v95_v58 = vmul.f32 %v86_v47, %v82_v51  ;;  %v101_v61 = vadd.f32 %v100_v55, %v99_v57  ;;  %v323_v57 = vld [vmem:[%s541_s4] ss:$0 sm:$0xff] }
  0xaa   :  { %v91_v60 = vmul.f32 %v86_v47, %v78_v56 }
  0xab   :  { %v115_v62 = vsel %vm96_vm0, %v95_v58, 0.0 }
  0xac   :  { %v116_v63 = vadd.f32 %v115_v62, %v114_v59  ;;  %v102_v3 = vsel %vm96_vm0, %v91_v60, 0.0 }
  0xad   :  { %v103_v7 = vadd.f32 %v102_v3, %v101_v61 }
  0xae   :  { %v117_v10 = vrot.slane %v116_v63, 4 }
  0xaf   :  { %v104_v11 = vrot.slane %v103_v7, 4 }
  0xb0   :  { %v118_v16 = vadd.f32 %v117_v10, %v116_v63 }
  0xb1   :  { %v105_v17 = vadd.f32 %v104_v11, %v103_v7 }
  0xb2   :  { %v119_v22 = vrot.slane %v118_v16, 2 }
  0xb3   :  { %v106_v24 = vrot.slane %v105_v17, 2 }
  0xb4   :  { %v120_v25 = vadd.f32 %v119_v22, %v118_v16 }
  0xb5   :  { %v107_v26 = vadd.f32 %v106_v24, %v105_v17 }
  0xb6   :  { %v121_v27 = vrot.slane %v120_v25, 1 }
  0xb7   :  { %v108_v30 = vrot.slane %v107_v26, 1 }
  0xb8   :  { %v122_v31 = vadd.f32 %v121_v27, %v120_v25 }
  0xb9   :  { %v109_v32 = vadd.f32 %v108_v30, %v107_v26 }
  0xba   :  { %v131_v33 = vadd.f32 %v322_v29, %v122_v31 }
  0xbb   :  { %v130_v35 = vadd.f32 %v322_v29, %v109_v32 }
  0xbc   :  { %v133_v36 = vmax.f32 %v131_v33, 0.0 }
  0xbd   :  { %v132_v37 = vmax.f32 %v130_v35, 0.0 }
  0xbe   :  { %v144_v38 = vrot.slane %v133_v36, %v497_v34 }
  0xbf   :  { %v137_v39 = vrot.slane %v132_v37, %v497_v34 }
  0xc0   :  { %146 = vbcast.lane.b32.xlu0 %v144_v38, 256 }
  0xc1   :  { %139 = vbcast.lane.b32.xlu1 %v137_v39, 256 }
 0x132   :  { %v147_v41 = vpop.permute.xlu0 %146 }
 0x133   :  { %v149_v42 = vmul.f32 %v147_v41, %v87_v40  ;;  %v140_v43 = vpop.permute.xlu1 %139 }
 0x134   :  { %v148_v44 = vmul.f32 %v140_v43, %v87_v40 }
 0x135   :  { %v158_v45 = vsel %vm150_vm1, %v149_v42, 0.0 }
 0x136   :  { %v159_v46 = vrot.slane %v158_v45, 4  ;;  %v151_v47 = vsel %vm150_vm1, %v148_v44, 0.0 }
 0x137   :  { %v152_v48 = vrot.slane %v151_v47, 4 }
 0x138   :  { %v160_v49 = vadd.f32 %v159_v46, %v158_v45 }
 0x139   :  { %v153_v50 = vadd.f32 %v152_v48, %v151_v47 }
 0x13a   :  { %v161_v51 = vrot.slane %v160_v49, 2 }
 0x13b   :  { %v154_v52 = vrot.slane %v153_v50, 2 }
 0x13c   :  { %v162_v53 = vadd.f32 %v161_v51, %v160_v49 }
 0x13d   :  { %v155_v54 = vadd.f32 %v154_v52, %v153_v50 }
 0x13e   :  { %v163_v55 = vrot.slane %v162_v53, 1 }
 0x13f   :  { %v156_v56 = vrot.slane %v155_v54, 1 }
 0x140   :  { %v164_v58 = vadd.f32 %v163_v55, %v162_v53 }
 0x141   :  { %v157_v59 = vadd.f32 %v156_v56, %v155_v54 }
 0x142   :  { %v173_v60 = vadd.f32 %v323_v57, %v164_v58 }
 0x143   :  { %v172_v61 = vadd.f32 %v323_v57, %v157_v59 }
 0x144   :  { %v176_v62 = vrot.slane %v173_v60, 7 }
 0x146   :  { %v178_v63 = vsel %vm177_vm2, %v176_v62, %v172_v61 }
 0x147   :  { %v180_v3 = vsel %vm150_vm1, %v178_v63, 0.0 }
 0x148   :  { %181 = vadd.xlane.f32.xlu1 %v180_v3 }
 0x1d1   :  { %v182_v7 = vpop.xlane.xlu1 %181 }
 0x1d2   :  { %v183_v10 = vrot.slane %v182_v7, 4 }
 0x1d4   :  { %v184_v11 = vadd.f32 %v183_v10, %v182_v7 }
 0x1d6   :  { %v185_v16 = vrot.slane %v184_v11, 2 }
 0x1d8   :  { %v186_v17 = vadd.f32 %v185_v16, %v184_v11 }
 0x1da   :  { %v187_v22 = vrot.slane %v186_v17, 1 }
 0x1dc   :  { %v188_v23 = vadd.f32 %v187_v22, %v186_v17 }
 0x1de   :  { %324 = vpush %v188_v23 }
 0x20f   :  { %s325_s4 = spop %324 }
 0x210   :  { %v190_v24 = vstv %s325_s4 }
 0x211   :  { %v191_v25 = vmul.f32 0.015625, %v190_v24 }
 0x213   :  { %v192_v26 = vsub.f32 %v172_v61, %v191_v25  ;;  %v193_v27 = vsub.f32 %v173_v60, %v191_v25 }
 0x215   :  { %v195_v28 = vmul.f32 %v193_v27, %v193_v27  ;;  %v194_v29 = vmul.f32 %v192_v26, %v192_v26 }
 0x217   :  { %v198_v30 = vrot.slane %v195_v28, 7  ;;  %v221_v47 = vsub.f32 0.0, %v194_v29  ;;  %v222_v48 = vsub.f32 0.0, %v195_v28 }
 0x219   :  { %v199_v31 = vsel %vm177_vm2, %v198_v30, %v194_v29 }
 0x21a   :  { %v201_v32 = vsel %vm150_vm1, %v199_v31, 0.0 }
 0x21b   :  { %202 = vadd.xlane.f32.xlu0 %v201_v32 }
 0x2a4   :  { %v203_v33 = vpop.xlane.xlu0 %202 }
 0x2a5   :  { %v204_v35 = vrot.slane %v203_v33, 4 }
 0x2a7   :  { %v205_v36 = vadd.f32 %v204_v35, %v203_v33 }
 0x2a9   :  { %v206_v37 = vrot.slane %v205_v36, 2 }
 0x2ab   :  { %v207_v38 = vadd.f32 %v206_v37, %v205_v36 }
 0x2ad   :  { %v208_v39 = vrot.slane %v207_v38, 1 }
 0x2af   :  { %v209_v40 = vadd.f32 %v208_v39, %v207_v38 }
 0x2b1   :  { %326 = vpush %v209_v40 }
 0x2e2   :  { %s327_s10 = spop %326 }
 0x2e3   :  { %v211_v41 = vstv %s327_s10 }
 0x2e4   :  { %v212_v42 = vmul.f32 0.015873017, %v211_v41 }
 0x2e6   :  { %v213_v43 = vmax.f32 %v212_v42, 1e-30 }
 0x2e8   :  { %332 = vrsqrt.f32 %v213_v43  ;;  %v223_v44 = vmul.f32 2.0, %v213_v43  ;;  %vm216_vm3 = vcmp.eq.f32.partialorder %v213_v43, inf  ;;  %v219_v49 = vand.u32 2147483648, %v213_v43 }
 0x2e9   :  { %vm218_vm4 = vcmp.eq.f32.partialorder %v213_v43, 0.0 }
 0x2ea   :  { %334 = vrcp.f32 %v223_v44 }
 0x2f5   :  { %v333_v45 = vpop.eup %332 }
 0x2f6   :  { %v215_v46 = vmul.f32 %v333_v45, %v213_v43 }
 0x2f7   :  { %v335_v50 = vpop.eup %334 }
 0x2f8   :  { %v217_v51 = vsel %vm216_vm3, %v213_v43, %v215_v46  ;;  %v225_v53 = vmul.f32 %v335_v50, %v221_v47  ;;  %v226_v54 = vmul.f32 %v335_v50, %v222_v48 }
 0x2f9   :  { %v220_v52 = vsel %vm218_vm4, %v219_v49, %v217_v51 }
 0x2fa   :  { %v231_v55 = vmul.f32 2.5066283, %v220_v52  ;;  %v227_v56 = vmul.f32 1.442695, %v225_v53  ;;  %v229_v57 = vmul.f32 1.442695, %v226_v54 }
 0x2fc   :  { %336 = vrcp.f32 %v231_v55 }
 0x2fd   :  { %338 = vpow2.f32 %v227_v56 }
 0x2fe   :  { %340 = vpow2.f32 %v229_v57 }
 0x309   :  { %v337_v58 = vpop.eup %336 }
 0x30a   :  { %v339_v59 = vpop.eup %338 }
 0x30b   :  { %v341_v60 = vpop.eup %340  ;;  %v233_v61 = vmul.f32 %v339_v59, %v337_v58 }
 0x30c   :  { %v234_v63 = vmul.f32 %v341_v60, %v337_v58 }
 0x30d   :  { %v238_v62 = vrot.slane %v233_v61, %v497_v34 }
 0x30e   :  { %v257_v3 = vrot.slane %v234_v63, %v497_v34 }
 0x30f   :  { %244 = vbcast.lane.b32.xlu1 %v238_v62, 264  ;;  %240 = vbcast.lane.b32.xlu0 %v238_v62, 256 }
 0x313   :  { %248 = vbcast.lane.b32.xlu1 %v238_v62, 272  ;;  %259 = vbcast.lane.b32.xlu0 %v257_v3, 256 }
 0x317   :  { %252 = vbcast.lane.b32.xlu1 %v238_v62, 280  ;;  %267 = vbcast.lane.b32.xlu0 %v257_v3, 272 }
 0x31b   :  { %263 = vbcast.lane.b32.xlu1 %v257_v3, 264 }
 0x31f   :  { %271 = vbcast.lane.b32.xlu1 %v257_v3, 280 }
 0x381   :  { %v245_v7 = vpop.permute.xlu1 %244  ;;  %v241_v10 = vpop.permute.xlu0 %240 }
 0x382   :  { %v275_v11 = vmul.f32 %v245_v7, %v442_v8  ;;  %v276_v16 = vmul.f32 %v245_v7, %v444_v9  ;;  %v273_v17 = vmul.f32 %v241_v10, %v430_v2  ;;  %v274_v22 = vmul.f32 %v241_v10, %v434_v4 }
 0x384   :  { %291 = vst [vmem:[#allocation5 + $0x10] sm:$0xff] %v275_v11  ;;  %292 = vst [vmem:[#allocation5 + $0x18] sm:$0xff] %v276_v16 }
 0x385   :  { %289 = vst [vmem:[#allocation5] sm:$0xff] %v273_v17  ;;  %290 = vst [vmem:[#allocation5 + $0x8] sm:$0xff] %v274_v22  ;;  %v249_v34 = vpop.permute.xlu1 %248  ;;  %v260_v23 = vpop.permute.xlu0 %259 }
 0x386   :  { %v277_v24 = vmul.f32 %v249_v34, %v454_v14  ;;  %v278_v25 = vmul.f32 %v249_v34, %v456_v15  ;;  %v281_v26 = vmul.f32 %v260_v23, %v426_v0  ;;  %v282_v8 = vmul.f32 %v260_v23, %v428_v1 }
 0x388   :  { %293 = vst [vmem:[#allocation5 + $0x20] sm:$0xff] %v277_v24  ;;  %294 = vst [vmem:[#allocation5 + $0x28] sm:$0xff] %v278_v25 }
 0x389   :  { %297 = vst [vmem:[#allocation5 + $0x40] sm:$0xff] %v281_v26  ;;  %298 = vst [vmem:[#allocation5 + $0x48] sm:$0xff] %v282_v8  ;;  %v253_v2 = vpop.permute.xlu1 %252  ;;  %v268_v4 = vpop.permute.xlu0 %267 }
 0x38a   :  { %v279_v9 = vmul.f32 %v253_v2, %v466_v20  ;;  %v280_v27 = vmul.f32 %v253_v2, %v468_v21  ;;  %v285_v28 = vmul.f32 %v268_v4, %v450_v12  ;;  %v286_v14 = vmul.f32 %v268_v4, %v452_v13 }
 0x38c   :  { %295 = vst [vmem:[#allocation5 + $0x30] sm:$0xff] %v279_v9  ;;  %296 = vst [vmem:[#allocation5 + $0x38] sm:$0xff] %v280_v27 }
 0x38d   :  { %301 = vst [vmem:[#allocation5 + $0x60] sm:$0xff] %v285_v28  ;;  %302 = vst [vmem:[#allocation5 + $0x68] sm:$0xff] %v286_v14  ;;  %v264_v0 = vpop.permute.xlu1 %263 }
 0x38e   :  { %v283_v1 = vmul.f32 %v264_v0, %v436_v5  ;;  %v284_v15 = vmul.f32 %v264_v0, %v438_v6 }
 0x390   :  { %299 = vst [vmem:[#allocation5 + $0x50] sm:$0xff] %v283_v1  ;;  %300 = vst [vmem:[#allocation5 + $0x58] sm:$0xff] %v284_v15 }
 0x391   :  { %v272_v20 = vpop.permute.xlu1 %271 }
 0x392   :  { %v287_v21 = vmul.f32 %v272_v20, %v462_v18  ;;  %v288_v12 = vmul.f32 %v272_v20, %v464_v19 }
 0x394   :  { %303 = vst [vmem:[#allocation5 + $0x70] sm:$0xff] %v287_v21  ;;  %304 = vst [vmem:[#allocation5 + $0x78] sm:$0xff] %v288_v12 }
 0x395   :  { %373 = shalt.err (!%p370_p9)
}
 0x396   :  { %316 = dma.vmem_to_hbm [thread:$0]  %s311_s12, 2048, %s542_s5, [#allocation4], %s387_s21, %s387_s21, %s388_s22  }
 0x397   :  { %384 = dma.done.wait [#allocation4], 2048  }
 0x398   :  { %385 = vsyncadd [#allocation4], 4294965248 }
 0x399   :  { %320 = vsyncpa [#allocation3], 1 }
 0x39a   :  { %321 = vsyncpa [#allocation4], 1 }

</bundles_post_ra>
